<compile_context>
chip_gen: v6e
topology: v6e:2x2x1
jax: 0.10.0
libtpu: 0.0.40
codegen_flags: <defaults>
</compile_context>

<pallas_src>
import math
import functools

import jax
import jax.numpy as jnp
from jax.experimental import pallas as pl
from jax.experimental.pallas import tpu as pltpu


def _round_up(a, b):
    return (a + b - 1) // b * b


def _patch_embed_kernel(p_ref, w_ref, b_ref, g_ref, beta_ref, o_ref, *, eps, e_true):
    # p_ref   : (TM, Kp)  im2col rows (bf16), K zero-padded to Kp
    # w_ref   : (Kp, Ep)  projection weight (bf16), zero-padded
    # b_ref   : (1,  Ep)  conv bias (f32), zero-padded
    # g_ref   : (1,  Ep)  LayerNorm gamma (f32), zero-padded
    # beta_ref: (1,  Ep)  LayerNorm beta (f32), zero-padded
    # o_ref   : (TM, Ep)  normalized embeddings (true values in [:, :e_true])
    x = jnp.dot(p_ref[...], w_ref[...], preferred_element_type=jnp.float32)
    x = x + b_ref[...]                      # padded E columns stay exactly 0.0

    # One-pass mean / variance over the TRUE embedding width (padded cols are 0,
    # so summing over the padded axis is exact).
    inv_e = jnp.float32(1.0 / e_true)
    s = jnp.sum(x, axis=-1, keepdims=True)
    ss = jnp.sum(x * x, axis=-1, keepdims=True)
    mean = s * inv_e
    var = jnp.maximum(ss * inv_e - mean * mean, 0.0)

    xn = (x - mean) * jax.lax.rsqrt(var + eps)
    # gamma/beta are 0 in the padded columns -> padded output columns are 0.
    o_ref[...] = (xn * g_ref[...] + beta_ref[...]).astype(o_ref.dtype)


def _im2col_nchw(x, kh, kw, stride, pad_h, pad_w):
    """Plain-JAX glue: NCHW -> (B*Ho*Wo, Cin*kh*kw), column order = (Cin, kh, kw)
    row-major, matching PyTorch conv weight.reshape(Cout, -1)."""
    B, C, H, W = x.shape
    xp = jnp.pad(x, ((0, 0), (0, 0), (pad_h, pad_h), (pad_w, pad_w)))
    Hp, Wp = H + 2 * pad_h, W + 2 * pad_w
    Ho = (Hp - kh) // stride + 1
    Wo = (Wp - kw) // stride + 1
    cols = []
    for i in range(kh):
        for j in range(kw):
            sl = xp[:, :, i:i + stride * (Ho - 1) + 1:stride,
                         j:j + stride * (Wo - 1) + 1:stride]  # (B, C, Ho, Wo)
            cols.append(sl)
    # stack -> (kh*kw, B, C, Ho, Wo) -> (B, Ho, Wo, C, kh*kw)
    patches = jnp.stack(cols, axis=0)
    patches = jnp.transpose(patches, (1, 3, 4, 2, 0))
    patches = patches.reshape(B * Ho * Wo, C * kh * kw)
    return patches, Ho, Wo


def overlap_patch_embed(x, conv_w, conv_b, ln_w, ln_b, *, stride, eps=1e-5,
                        tm=512, compute_dtype=jnp.bfloat16):
    """Forward of OverlapPatchEmbed.

    x      : (B, Cin, Hin, Win)  NCHW, as in PyTorch.
    conv_w : (E, Cin, kh, kw)    PyTorch Conv2d weight layout.
    conv_b : (E,)
    ln_w   : (E,)   LayerNorm gamma
    ln_b   : (E,)   LayerNorm beta
    Returns (out, Ho, Wo) with out shape (B, Ho*Wo, E), dtype = x.dtype.
    """
    B, Cin, Hin, Win = x.shape
    E, _, kh, kw = conv_w.shape
    pad_h, pad_w = kh // 2, kw // 2

    # im2col in the (narrow) compute dtype so the extraction/transpose moves
    # half the bytes and the kernel's dominant HBM stream is bf16.
    patches, Ho, Wo = _im2col_nchw(x.astype(compute_dtype), kh, kw, stride,
                                   pad_h, pad_w)                    # (M, K)
    M, K = patches.shape

    # Lane-align K and E, pick a VMEM-safe row tile, pad M to a tile multiple.
    Kp = _round_up(K, 128)
    Ep = _round_up(E, 128)
    p_bytes = jnp.dtype(compute_dtype).itemsize
    o_bytes = jnp.dtype(x.dtype).itemsize

    tm_eff = max(16, min(int(tm), _round_up(M, 16)))

    def _vmem_est(t):
        # double-buffered inputs/outputs + resident weight (2 copies) + f32 temps
        return (2 * t * Kp * p_bytes          # patch tiles
                + 2 * Kp * Ep * p_bytes       # weight
                + 2 * t * Ep * o_bytes        # output tiles
                + 6 * Ep * 4                  # bias/gamma/beta
                + 4 * t * Ep * 4)             # f32 intermediates headroom

    VMEM_BUDGET = 48 * 1024 * 1024            # v7x-safe (64 MiB physical per TC)
    while tm_eff > 64 and _vmem_est(tm_eff) > VMEM_BUDGET:
        tm_eff //= 2
    Mp = _round_up(M, tm_eff)

    patches_p = jnp.pad(patches, ((0, Mp - M), (0, Kp - K)))
    w_mat = conv_w.reshape(E, K).T.astype(compute_dtype)             # (K, E)
    w_p = jnp.pad(w_mat, ((0, Kp - K), (0, Ep - E)))
    b_row = jnp.pad(conv_b.astype(jnp.float32), (0, Ep - E)).reshape(1, Ep)
    g_row = jnp.pad(ln_w.astype(jnp.float32), (0, Ep - E)).reshape(1, Ep)
    beta_row = jnp.pad(ln_b.astype(jnp.float32), (0, Ep - E)).reshape(1, Ep)

    vmem_limit = int(min(max(2 * _vmem_est(tm_eff), 32 * 1024 * 1024),
                         VMEM_BUDGET))

    kernel = functools.partial(_patch_embed_kernel, eps=eps, e_true=E)
    out_flat = pl.pallas_call(
        kernel,
        out_shape=jax.ShapeDtypeStruct((Mp, Ep), x.dtype),
        grid_spec=pltpu.PrefetchScalarGridSpec(
            num_scalar_prefetch=0,
            grid=(Mp // tm_eff,),
            in_specs=[
                pl.BlockSpec((tm_eff, Kp), lambda i: (i, 0)),  # im2col rows (tiled)
                pl.BlockSpec((Kp, Ep), lambda i: (0, 0)),      # projection weight
                pl.BlockSpec((1, Ep), lambda i: (0, 0)),       # conv bias
                pl.BlockSpec((1, Ep), lambda i: (0, 0)),       # LN gamma
                pl.BlockSpec((1, Ep), lambda i: (0, 0)),       # LN beta
            ],
            out_specs=pl.BlockSpec((tm_eff, Ep), lambda i: (i, 0)),
        ),
        compiler_params=pltpu.CompilerParams(
            dimension_semantics=("parallel",),
            vmem_limit_bytes=vmem_limit),
    )(patches_p, w_p, b_row, g_row, beta_row)

    out = out_flat[:M, :E].reshape(B, Ho * Wo, E)
    return out, Ho, Wo


def _reference(x, conv_w, conv_b, ln_w, ln_b, *, stride, eps=1e-5,
               matmul_dtype=None):
    """Pure-JAX reference (lax.conv + LayerNorm). If matmul_dtype is given,
    the conv operands are cast to it (f32 accumulation) to mirror the kernel's
    bf16 MXU inputs for a tight comparison."""
    kh, kw = conv_w.shape[2], conv_w.shape[3]
    xc = x if matmul_dtype is None else x.astype(matmul_dtype)
    wc = conv_w if matmul_dtype is None else conv_w.astype(matmul_dtype)
    y = jax.lax.conv_general_dilated(
        xc, wc,
        window_strides=(stride, stride),
        padding=((kh // 2, kh // 2), (kw // 2, kw // 2)),
        dimension_numbers=("NCHW", "OIHW", "NCHW"),
        preferred_element_type=jnp.float32)
    y = y + conv_b.reshape(1, -1, 1, 1).astype(jnp.float32)
    B, E, Ho, Wo = y.shape
    y = y.reshape(B, E, Ho * Wo).transpose(0, 2, 1)    # (B, N, E)
    mean = jnp.mean(y, axis=-1, keepdims=True)
    var = jnp.mean(jnp.square(y - mean), axis=-1, keepdims=True)
    y = (y - mean) * jax.lax.rsqrt(var + eps)
    y = y * ln_w.reshape(1, 1, -1) + ln_b.reshape(1, 1, -1)
    return y, Ho, Wo


if __name__ == "__main__":
    # Small config consistent with the module: img 16x16, patch 7, stride 4.
    B, Cin, Hin, Win = 2, 4, 16, 16
    patch_size, stride, embed_dim = 7, 4, 32

    key = jax.random.PRNGKey(0)
    kx, kw_ = jax.random.split(key)

    x = jax.random.normal(kx, (B, Cin, Hin, Win), dtype=jnp.float32)

    # Deterministic init mirroring _init_weights:
    #   Conv2d: weight ~ N(0, sqrt(2/fan_out)), bias = 0
    #   LayerNorm: weight = 1, bias = 0
    fan_out = patch_size * patch_size * embed_dim
    conv_w = jax.random.normal(
        kw_, (embed_dim, Cin, patch_size, patch_size),
        dtype=jnp.float32) * math.sqrt(2.0 / fan_out)
    conv_b = jnp.zeros((embed_dim,), jnp.float32)
    ln_w = jnp.ones((embed_dim,), jnp.float32)
    ln_b = jnp.zeros((embed_dim,), jnp.float32)

    out, H, W = overlap_patch_embed(x, conv_w, conv_b, ln_w, ln_b, stride=stride)
    out = jax.block_until_ready(out)

    # Tight check against a reference whose matmul operands are also bf16.
    ref_m, Href, Wref = _reference(x, conv_w, conv_b, ln_w, ln_b,
                                   stride=stride, matmul_dtype=jnp.bfloat16)
    # Loose sanity check against the exact f32 reference (bf16 MXU rounding).
    ref_f32, _, _ = _reference(x, conv_w, conv_b, ln_w, ln_b, stride=stride)

    assert (H, W) == (Href, Wref)
    assert out.shape == (B, H * W, embed_dim)
    assert jnp.allclose(out, ref_m, atol=2e-3, rtol=2e-3)
    assert jnp.allclose(out, ref_f32, atol=6e-2, rtol=6e-2)

    print("KERNEL_OK")
</pallas_src>

<mosaic_0001>
module attributes {stable_mosaic.version = 11 : i64} {
  func.func @_patch_embed_kernel(%arg0: i32, %arg1: memref<32x256xbf16, #tpu.memory_space<vmem>>, %arg2: memref<256x128xbf16, #tpu.memory_space<vmem>>, %arg3: memref<1x128xf32, #tpu.memory_space<vmem>>, %arg4: memref<1x128xf32, #tpu.memory_space<vmem>>, %arg5: memref<1x128xf32, #tpu.memory_space<vmem>>, %arg6: memref<32x128xf32, #tpu.memory_space<vmem>>) attributes {dimension_semantics = [#tpu.dimension_semantics<parallel>], iteration_bounds = array<i64: 1>, scalar_prefetch = 0 : i64, scratch_operands = 0 : i64, tpu.core_type = #tpu.core_type<tc>, window_params = [{transform_indices = @transform_0, window_bounds = array<i64: 32, 256>}, {pipeline_mode = #tpu.pipeline_mode<synchronous>, transform_indices = @transform_1, window_bounds = array<i64: 256, 128>}, {pipeline_mode = #tpu.pipeline_mode<synchronous>, transform_indices = @transform_2, window_bounds = array<i64: 1, 128>}, {pipeline_mode = #tpu.pipeline_mode<synchronous>, transform_indices = @transform_3, window_bounds = array<i64: 1, 128>}, {pipeline_mode = #tpu.pipeline_mode<synchronous>, transform_indices = @transform_4, window_bounds = array<i64: 1, 128>}, {transform_indices = @transform_5, window_bounds = array<i64: 32, 128>}]} {
    %c0 = arith.constant 0 : index
    %c0_0 = arith.constant 0 : index
    %0 = vector.load %arg1[%c0, %c0_0] : memref<32x256xbf16, #tpu.memory_space<vmem>>, vector<32x256xbf16>
    %c0_1 = arith.constant 0 : index
    %c0_2 = arith.constant 0 : index
    %1 = vector.load %arg2[%c0_1, %c0_2] : memref<256x128xbf16, #tpu.memory_space<vmem>>, vector<256x128xbf16>
    %cst = arith.constant dense<0.000000e+00> : vector<32x128xf32>
    %2 = tpu.matmul %0, %1, %cst {dimension_numbers = #tpu.dot_dimension_numbers<[1], [0], [0], [1], [0, 0, 1, 1], [], []>} : vector<32x256xbf16>, vector<256x128xbf16>, vector<32x128xf32> -> vector<32x128xf32>
    %c0_3 = arith.constant 0 : index
    %c0_4 = arith.constant 0 : index
    %3 = vector.load %arg3[%c0_3, %c0_4] : memref<1x128xf32, #tpu.memory_space<vmem>>, vector<1x128xf32>
    %4 = vector.broadcast %3 : vector<1x128xf32> to vector<32x128xf32>
    %5 = arith.addf %2, %4 : vector<32x128xf32>
    %cst_5 = arith.constant dense<0.000000e+00> : vector<32xf32>
    %6 = vector.multi_reduction <add>, %5, %cst_5 [1] : vector<32x128xf32> to vector<32xf32>
    %7 = vector.shape_cast %6 : vector<32xf32> to vector<32x1xf32>
    %8 = arith.mulf %5, %5 : vector<32x128xf32>
    %cst_6 = arith.constant dense<0.000000e+00> : vector<32xf32>
    %9 = vector.multi_reduction <add>, %8, %cst_6 [1] : vector<32x128xf32> to vector<32xf32>
    %10 = vector.shape_cast %9 : vector<32xf32> to vector<32x1xf32>
    %cst_7 = arith.constant 3.125000e-02 : f32
    %11 = vector.broadcast %cst_7 : f32 to vector<32x1xf32>
    %12 = arith.mulf %7, %11 : vector<32x1xf32>
    %cst_8 = arith.constant 3.125000e-02 : f32
    %13 = vector.broadcast %cst_8 : f32 to vector<32x1xf32>
    %14 = arith.mulf %10, %13 : vector<32x1xf32>
    %15 = arith.mulf %12, %12 : vector<32x1xf32>
    %16 = arith.subf %14, %15 : vector<32x1xf32>
    %cst_9 = arith.constant 0.000000e+00 : f32
    %17 = vector.broadcast %cst_9 : f32 to vector<32x1xf32>
    %18 = arith.maximumf %16, %17 : vector<32x1xf32>
    %19 = vector.broadcast %12 : vector<32x1xf32> to vector<32x128xf32>
    %20 = arith.subf %5, %19 : vector<32x128xf32>
    %cst_10 = arith.constant 9.99999974E-6 : f32
    %21 = vector.broadcast %cst_10 : f32 to vector<32x1xf32>
    %22 = arith.addf %18, %21 : vector<32x1xf32>
    %23 = math.rsqrt %22 : vector<32x1xf32>
    %24 = vector.broadcast %23 : vector<32x1xf32> to vector<32x128xf32>
    %25 = arith.mulf %20, %24 : vector<32x128xf32>
    %c0_11 = arith.constant 0 : index
    %c0_12 = arith.constant 0 : index
    %26 = vector.load %arg4[%c0_11, %c0_12] : memref<1x128xf32, #tpu.memory_space<vmem>>, vector<1x128xf32>
    %27 = vector.broadcast %26 : vector<1x128xf32> to vector<32x128xf32>
    %28 = arith.mulf %25, %27 : vector<32x128xf32>
    %c0_13 = arith.constant 0 : index
    %c0_14 = arith.constant 0 : index
    %29 = vector.load %arg5[%c0_13, %c0_14] : memref<1x128xf32, #tpu.memory_space<vmem>>, vector<1x128xf32>
    %30 = vector.broadcast %29 : vector<1x128xf32> to vector<32x128xf32>
    %31 = arith.addf %28, %30 : vector<32x128xf32>
    %c0_15 = arith.constant 0 : index
    %c0_16 = arith.constant 0 : index
    %32 = vector.load %arg6[%c0_15, %c0_16] : memref<32x128xf32, #tpu.memory_space<vmem>>, vector<32x128xf32>
    tpu.vector_store %arg6[%c0_15, %c0_16], %31 {strides = array<i32>} : memref<32x128xf32, #tpu.memory_space<vmem>>, vector<32x128xf32>,
    return
  }
  func.func @transform_0(%arg0: i32) -> (i32, i32) {
    %c0_i32 = arith.constant 0 : i32
    %c0_i32_0 = arith.constant 0 : i32
    return %arg0, %c0_i32 : i32, i32
  }
  func.func @transform_1(%arg0: i32) -> (i32, i32) {
    %c0_i32 = arith.constant 0 : i32
    %c0_i32_0 = arith.constant 0 : i32
    %c0_i32_1 = arith.constant 0 : i32
    return %c0_i32, %c0_i32_0 : i32, i32
  }
  func.func @transform_2(%arg0: i32) -> (i32, i32) {
    %c0_i32 = arith.constant 0 : i32
    %c0_i32_0 = arith.constant 0 : i32
    %c0_i32_1 = arith.constant 0 : i32
    return %c0_i32, %c0_i32_0 : i32, i32
  }
  func.func @transform_3(%arg0: i32) -> (i32, i32) {
    %c0_i32 = arith.constant 0 : i32
    %c0_i32_0 = arith.constant 0 : i32
    %c0_i32_1 = arith.constant 0 : i32
    return %c0_i32, %c0_i32_0 : i32, i32
  }
  func.func @transform_4(%arg0: i32) -> (i32, i32) {
    %c0_i32 = arith.constant 0 : i32
    %c0_i32_0 = arith.constant 0 : i32
    %c0_i32_1 = arith.constant 0 : i32
    return %c0_i32, %c0_i32_0 : i32, i32
  }
  func.func @transform_5(%arg0: i32) -> (i32, i32) {
    %c0_i32 = arith.constant 0 : i32
    %c0_i32_0 = arith.constant 0 : i32
    return %arg0, %c0_i32 : i32, i32
  }
}

</mosaic_0001>

<bundles_post_ra>
// kernel: tpu_custom_call.1
= control target key start
LH: loop header
LB: loop body
LE: loop exit
PB: predicated region body
PF: predicated region fallthrough
CT: control target
= control target key end

     0   :  { %10 = vsyncpa [#allocation3], 0  ;;  %s601_s0 = inlined_call_operand.hbm [shape: bf16[32,256], index: 0, kind: input, shape index: {}]   ;;  %s602_s1 = inlined_call_operand.hbm [shape: bf16[256,128], index: 1, kind: input, shape index: {}]   ;;  %s603_s2 = inlined_call_operand.vmem [shape: f32[1,128], index: 2, kind: input, shape index: {}]   ;;  %s604_s3 = inlined_call_operand.vmem [shape: f32[1,128], index: 3, kind: input, shape index: {}]   ;;  %s605_s4 = inlined_call_operand.vmem [shape: f32[1,128], index: 4, kind: input, shape index: {}]   ;;  %s606_s5 = inlined_call_operand.hbm [shape: f32[32,128], index: 5, kind: output, shape index: {}]  }
   0x1   :  { %11 = vsyncpa [#allocation6], 0 }
   0x2   :  { %12 = vsyncpa [#allocation4], 0  ;;  %s528_s18 = smov [#allocation2]  }
   0x3   :  { %s18_s19 = sshll.u32 %s528_s18, 4  ;;  %s19_s19 = int_to_ptr.vmem [resolvable:$true] %s18_s19 }
   0x4   :  { %s470_s20 = scalar_lea.vmem %s19_s19, 512  ;;  %p475_p1 = scmp.lt.s32.totalorder %s19_s19, %s19_s19 }
   0x5   :  { %p471_p0 = scmp.ne.s32.totalorder %s19_s19, %s470_s20  ;;  %p476_p2 = scmp.lt.s32.totalorder %s470_s20, %s470_s20 }
   0x7   :  { %p477_p3 = por %p476_p2, %p475_p1 }
   0x9   :  { %p478_p4 = pnand %p477_p3, %p471_p0 }
   0xb   :  { %481 = shalt.err (!%p478_p4)
}
   0xc   :  { %s529_s21 = smov 128   ;;  %s530_s22 = smov 8  }
   0xd   :  { %24 = dma.hbm_to_vmem [thread:$0]  %s601_s0, 512, %s19_s19, [#allocation3], %s529_s21, %s529_s21, %s530_s22  }
   0xe   :  { %s531_s25 = smov [#allocation5]  }
   0xf   :  { %s30_s26 = sshll.u32 %s531_s25, 4  ;;  %s31_s26 = int_to_ptr.vmem [resolvable:$true] %s30_s26 }
  0x10   :  { %s490_s27 = scalar_lea.vmem %s31_s26, 2048  ;;  %p495_p6 = scmp.lt.s32.totalorder %s31_s26, %s31_s26 }
  0x11   :  { %p491_p5 = scmp.ne.s32.totalorder %s31_s26, %s490_s27  ;;  %p496_p7 = scmp.lt.s32.totalorder %s490_s27, %s490_s27 }
  0x13   :  { %p497_p8 = por %p496_p7, %p495_p6 }
  0x15   :  { %p498_p9 = pnand %p497_p8, %p491_p5 }
  0x17   :  { %501 = shalt.err (!%p498_p9)
}
  0x18   :  { %s532_s28 = smov 64   ;;  %s533_s29 = smov 4  }
  0x19   :  { %36 = dma.hbm_to_vmem [thread:$0]  %s602_s1, 2048, %s31_s26, [#allocation6], %s532_s28, %s532_s28, %s533_s29  }
  0x1a   :  { %522 = dma.done.wait [#allocation3], 512  }
  0x1b   :  { %523 = vsyncadd [#allocation3], 4294966784 }
  0x1c   :  { %524 = dma.done.wait [#allocation6], 2048  }
  0x1d   :  { %525 = vsyncadd [#allocation6], 4294965248  ;;  %v432_v0 = vld [vmem:[#allocation5 + $0x78] sm:$0xff]   ;;  %v434_v2 = vld [vmem:[#allocation5 + $0x70] sm:$0xff]  }
  0x1e   :  { %v433_v1 = vld [vmem:[#allocation5 + $0x38] sm:$0xff]   ;;  %381 = vmatprep.subr.bf16.mxu0 %v432_v0  ;;  %409 = vmatprep.subr.bf16.mxu1 %v432_v0  ;;  %v435_v3 = vld [vmem:[#allocation5 + $0x30] sm:$0xff]   ;;  %v436_v4 = vld [vmem:[#allocation5 + $0x68] sm:$0xff]  }
  0x1f   :  { %382 = vmatpush3.bf16.msra.mxu0 %v433_v1  ;;  %417 = vmatpush3.bf16.msra.mxu1 %v433_v1  ;;  %v437_v5 = vld [vmem:[#allocation5 + $0x28] sm:$0xff]   ;;  %v438_v6 = vld [vmem:[#allocation5 + $0x60] sm:$0xff]   ;;  %v440_v8 = vld [vmem:[#allocation5 + $0x58] sm:$0xff]  }
  0x20   :  { %383 = vmatprep.subr.bf16.mxu0 %v434_v2  ;;  %410 = vmatprep.subr.bf16.mxu1 %v434_v2  ;;  %v439_v7 = vld [vmem:[#allocation5 + $0x20] sm:$0xff]   ;;  %v441_v9 = vld [vmem:[#allocation5 + $0x18] sm:$0xff]   ;;  %v442_v10 = vld [vmem:[#allocation5 + $0x50] sm:$0xff]  }
  0x21   :  { %v450_v11 = vld [vmem:[#allocation2 + $0x4] ss:$8 sps:$4 sm:$0xff]   ;;  %v453_v12 = vld [vmem:[#allocation2 + $0x14] ss:$8 sps:$4 sm:$0xff]   ;;  %v448_v18 = vld [vmem:[#allocation2] ss:$8 sps:$4 sm:$0xff]  }
  0x22   :  { %v443_v13 = vld [vmem:[#allocation5 + $0x10] sm:$0xff]   ;;  %v444_v14 = vld [vmem:[#allocation5 + $0x48] sm:$0xff]   ;;  %241 = vmatprep.mubr.bf16.mxu0 %v450_v11  ;;  %249 = vmatprep.mubr.bf16.mxu1 %v453_v12  ;;  %v446_v16 = vld [vmem:[#allocation5 + $0x40] sm:$0xff]  }
  0x23   :  { %384 = vmatpush3.bf16.msra.mxu0 %v435_v3  ;;  %418 = vmatpush3.bf16.msra.mxu1 %v435_v3  ;;  %v445_v15 = vld [vmem:[#allocation5 + $0x8] sm:$0xff]   ;;  %v447_v17 = vld [vmem:[#allocation5] sm:$0xff]   ;;  %v451_v19 = vld [vmem:[#allocation2 + $0x10] ss:$8 sps:$4 sm:$0xff]  }
  0x24   :  { %385 = vmatprep.subr.bf16.mxu0 %v436_v4  ;;  %411 = vmatprep.subr.bf16.mxu1 %v436_v4  ;;  %v358_v22 = vld [vmem:[%s603_s2] ss:$0 sm:$0xff] }
  0x25   :  { %v379_v11 = vld [vmem:[%s604_s3] ss:$0 sm:$0xff]  ;;  %s534_s3 = smov [#allocation7]  }
  0x26   :  { %s345_s10 = sshll.u32 %s534_s3, 4  ;;  %s346_s10 = int_to_ptr.vmem [resolvable:$true] %s345_s10 }
  0x27   :  { %386 = vmatpush3.bf16.msra.mxu0 %v437_v5  ;;  %419 = vmatpush3.bf16.msra.mxu1 %v437_v5  ;;  %p507_p11 = scmp.lt.s32.totalorder %s346_s10, %s346_s10 }
  0x28   :  { %387 = vmatprep.subr.bf16.mxu0 %v438_v6  ;;  %412 = vmatprep.subr.bf16.mxu1 %v438_v6 }
  0x2b   :  { %388 = vmatpush3.bf16.msra.mxu0 %v439_v7  ;;  %420 = vmatpush3.bf16.msra.mxu1 %v439_v7 }
  0x2c   :  { %389 = vmatprep.subr.bf16.mxu0 %v440_v8  ;;  %413 = vmatprep.subr.bf16.mxu1 %v440_v8 }
  0x2f   :  { %390 = vmatpush3.bf16.msra.mxu0 %v441_v9  ;;  %421 = vmatpush3.bf16.msra.mxu1 %v441_v9 }
  0x30   :  { %391 = vmatprep.subr.bf16.mxu0 %v442_v10  ;;  %414 = vmatprep.subr.bf16.mxu1 %v442_v10 }
  0x33   :  { %392 = vmatpush3.bf16.msra.mxu0 %v443_v13  ;;  %422 = vmatpush3.bf16.msra.mxu1 %v443_v13  ;;  %v380_v13 = vld [vmem:[%s605_s4] ss:$0 sm:$0xff]  ;;  %s502_s4 = scalar_lea.vmem %s346_s10, 512 }
  0x34   :  { %393 = vmatprep.subr.bf16.mxu0 %v444_v14  ;;  %415 = vmatprep.subr.bf16.mxu1 %v444_v14  ;;  %p503_p10 = scmp.ne.s32.totalorder %s346_s10, %s502_s4  ;;  %p508_p12 = scmp.lt.s32.totalorder %s502_s4, %s502_s4 }
  0x36   :  { %p509_p13 = por %p508_p12, %p507_p11 }
  0x37   :  { %394 = vmatpush3.bf16.msra.mxu0 %v445_v15  ;;  %423 = vmatpush3.bf16.msra.mxu1 %v445_v15 }
  0x38   :  { %395 = vmatprep.subr.bf16.mxu0 %v446_v16  ;;  %416 = vmatprep.subr.bf16.mxu1 %v446_v16  ;;  %p510_p0 = pnand %p509_p13, %p503_p10 }
  0x3b   :  { %396 = vmatpush3.bf16.msra.mxu0 %v447_v17  ;;  %424 = vmatpush3.bf16.msra.mxu1 %v447_v17 }
  0x3e   :  { %242 = vmatmul.mubr.bf16.vlgmr.msra.gmra.mxu0 %v448_v18  ;;  %250 = vmatmul.mubr.bf16.vlgmr.msra.gmra.mxu1 %v451_v19 }
  0xfe   :  { %v397_v20 = vpop.f32.mrf.mxu0  ;;  %v403_v21 = vpop.f32.mrf.mxu1 }
 0x100   :  { %v398_v23 = vpop.f32.mrf.mxu0  ;;  %v404_v24 = vpop.f32.mrf.mxu1 }
 0x101   :  { %v399_v25 = vadd.f32 %v398_v23, %v397_v20  ;;  %v405_v26 = vadd.f32 %v404_v24, %v403_v21 }
 0x102   :  { %v400_v27 = vpop.f32.mrf.mxu0  ;;  %v406_v28 = vpop.f32.mrf.mxu1 }
 0x103   :  { %v244_v29 = vadd.f32 %v399_v25, %v358_v22  ;;  %v577_v30 = vadd.f32 %v405_v26, %v358_v22 }
 0x104   :  { %v401_v31 = vpop.f32.mrf.mxu0  ;;  %v407_v32 = vpop.f32.mrf.mxu1 }
 0x105   :  { %v402_v33 = vadd.f32 %v401_v31, %v400_v27  ;;  %v408_v34 = vadd.f32 %v407_v32, %v406_v28  ;;  %262 = vadd.xlane.f32.xlu1 %v577_v30  ;;  %258 = vadd.xlane.f32.xlu0 %v244_v29  ;;  %v266_v37 = vmul.f32 %v244_v29, %v244_v29 }
 0x106   :  { %v268_v40 = vmul.f32 %v577_v30, %v577_v30 }
 0x107   :  { %v247_v35 = vadd.f32 %v402_v33, %v358_v22  ;;  %v580_v36 = vadd.f32 %v408_v34, %v358_v22 }
 0x109   :  { %264 = vadd.xlane.f32.xlu1 %v580_v36  ;;  %270 = vadd.xlane.f32.xlu0 %v266_v37  ;;  %v267_v38 = vmul.f32 %v247_v35, %v247_v35  ;;  %v269_v39 = vmul.f32 %v580_v36, %v580_v36 }
 0x10d   :  { %272 = vadd.xlane.f32.xlu1 %v267_v38  ;;  %260 = vadd.xlane.f32.xlu0 %v247_v35 }
 0x111   :  { %276 = vadd.xlane.f32.xlu1 %v269_v39  ;;  %274 = vadd.xlane.f32.xlu0 %v268_v40 }
 0x18e   :  { %v263_v41 = vpop.xlane.xlu1 %262  ;;  %v259_v42 = vpop.xlane.xlu0 %258 }
 0x18f   :  { %v278_v43 = vmul.f32 0.03125, %v259_v42  ;;  %v280_v49 = vmul.f32 0.03125, %v263_v41 }
 0x191   :  { %v286_v46 = vmul.f32 %v278_v43, %v278_v43  ;;  %v288_v58 = vmul.f32 %v280_v49, %v280_v49  ;;  %v298_v9 = vsub.f32 %v244_v29, %v278_v43  ;;  %v300_v21 = vsub.f32 %v577_v30, %v280_v49 }
 0x192   :  { %v265_v44 = vpop.xlane.xlu1 %264  ;;  %v271_v45 = vpop.xlane.xlu0 %270 }
 0x193   :  { %v282_v47 = vmul.f32 0.03125, %v271_v45  ;;  %v281_v50 = vmul.f32 0.03125, %v265_v44 }
 0x195   :  { %v290_v48 = vsub.f32 %v282_v47, %v286_v46  ;;  %v289_v59 = vmul.f32 %v281_v50, %v281_v50  ;;  %v301_v18 = vsub.f32 %v580_v36, %v281_v50 }
 0x196   :  { %v273_v51 = vpop.xlane.xlu1 %272  ;;  %v261_v52 = vpop.xlane.xlu0 %260 }
 0x197   :  { %v294_v53 = vmax.f32 %v290_v48, 0.0  ;;  %v279_v54 = vmul.f32 0.03125, %v261_v52  ;;  %v283_v56 = vmul.f32 0.03125, %v273_v51 }
 0x199   :  { %v302_v55 = vadd.f32 1e-05, %v294_v53  ;;  %v287_v57 = vmul.f32 %v279_v54, %v279_v54  ;;  %v299_v15 = vsub.f32 %v247_v35, %v279_v54 }
 0x19a   :  { %v277_v60 = vpop.xlane.xlu1 %276  ;;  %v275_v61 = vpop.xlane.xlu0 %274 }
 0x19b   :  { %454 = vrsqrt.f32 %v302_v55  ;;  %v291_v62 = vsub.f32 %v283_v56, %v287_v57  ;;  %v285_v63 = vmul.f32 0.03125, %v277_v60  ;;  %v284_v0 = vmul.f32 0.03125, %v275_v61 }
 0x19d   :  { %v295_v1 = vmax.f32 %v291_v62, 0.0  ;;  %v293_v2 = vsub.f32 %v285_v63, %v289_v59  ;;  %v292_v3 = vsub.f32 %v284_v0, %v288_v58 }
 0x19f   :  { %v303_v4 = vadd.f32 1e-05, %v295_v1  ;;  %v297_v5 = vmax.f32 %v293_v2, 0.0  ;;  %v296_v6 = vmax.f32 %v292_v3, 0.0 }
 0x1a1   :  { %456 = vrsqrt.f32 %v303_v4  ;;  %v305_v7 = vadd.f32 1e-05, %v297_v5  ;;  %v304_v8 = vadd.f32 1e-05, %v296_v6 }
 0x1a3   :  { %458 = vrsqrt.f32 %v305_v7 }
 0x1a4   :  { %460 = vrsqrt.f32 %v304_v8 }
 0x1a8   :  { %v455_v10 = vpop.eup %454 }
 0x1a9   :  { %v310_v12 = vmul.f32 %v455_v10, %v298_v9 }
 0x1ab   :  { %v321_v14 = vmul.f32 %v379_v11, %v310_v12 }
 0x1ad   :  { %v332_v16 = vadd.f32 %v380_v13, %v321_v14 }
 0x1ae   :  { %v457_v17 = vpop.eup %456 }
 0x1af   :  { %v311_v19 = vmul.f32 %v457_v17, %v299_v15  ;;  %336 = vst [vmem:[#allocation7] sm:$0xff] %v332_v16 }
 0x1b0   :  { %v459_v20 = vpop.eup %458 }
 0x1b1   :  { %v461_v22 = vpop.eup %460  ;;  %v322_v23 = vmul.f32 %v379_v11, %v311_v19  ;;  %v313_v24 = vmul.f32 %v459_v20, %v301_v18 }
 0x1b2   :  { %v312_v25 = vmul.f32 %v461_v22, %v300_v21 }
 0x1b3   :  { %v333_v26 = vadd.f32 %v380_v13, %v322_v23  ;;  %v324_v27 = vmul.f32 %v379_v11, %v313_v24 }
 0x1b4   :  { %v323_v28 = vmul.f32 %v379_v11, %v312_v25 }
 0x1b5   :  { %337 = vst [vmem:[#allocation7 + $0x8] sm:$0xff] %v333_v26  ;;  %v335_v29 = vadd.f32 %v380_v13, %v324_v27 }
 0x1b6   :  { %v334_v31 = vadd.f32 %v380_v13, %v323_v28 }
 0x1b7   :  { %339 = vst [vmem:[#allocation7 + $0x18] sm:$0xff] %v335_v29 }
 0x1b8   :  { %338 = vst [vmem:[#allocation7 + $0x10] sm:$0xff] %v334_v31 }
 0x1b9   :  { %513 = shalt.err (!%p510_p0)
}
 0x1ba   :  { %351 = dma.vmem_to_hbm [thread:$0]  %s346_s10, 512, %s606_s5, [#allocation4], %s529_s21, %s529_s21, %s530_s22  }
 0x1bb   :  { %526 = dma.done.wait [#allocation4], 512  }
 0x1bc   :  { %527 = vsyncadd [#allocation4], 4294966784 }
 0x1bd   :  { %355 = vsyncpa [#allocation3], 1 }
 0x1be   :  { %356 = vsyncpa [#allocation6], 1 }
 0x1bf   :  { %357 = vsyncpa [#allocation4], 1 }

</bundles_post_ra>
